<compile_context>
chip_gen: v5e
topology: v5e:2x2
jax: 0.10.0
libtpu: 0.0.40
codegen_flags: <defaults>
</compile_context>

<pallas_src>
import functools

import jax
import jax.numpy as jnp
from jax import lax
from jax.experimental import pallas as pl
from jax.experimental.pallas import tpu as pltpu


# ---------------------------------------------------------------------------
# lane-shift helper (XLU rotate) + one-time roll-convention probe
# ---------------------------------------------------------------------------
@functools.lru_cache(maxsize=None)
def _roll_is_numpy_convention() -> bool:
    """True iff pltpu.roll(x, s, axis)[l] == x[(l - s) % n] (np.roll semantics).

    Tiny one-time probe; its result is a Python constant baked into the main
    kernel trace, so the conv-tap / weight pairing is independent of the
    rotate convention."""
    def _probe(x_ref, o_ref):
        o_ref[...] = pltpu.roll(x_ref[...], 1, axis=1)

    x = lax.broadcasted_iota(jnp.int32, (8, 128), 1)
    y = pl.pallas_call(
        _probe, out_shape=jax.ShapeDtypeStruct((8, 128), jnp.int32))(x)
    return int(jax.device_get(y)[0, 1]) == 0


def _shift_left(v, d, n, roll_np):
    """out[..., l] = v[..., (l + d) % n] along the last (lane) axis."""
    d = d % n
    if d == 0:
        return v
    amount = (n - d) if roll_np else d          # always non-negative
    return pltpu.roll(v, amount, axis=v.ndim - 1)


# ---------------------------------------------------------------------------
# in-kernel building blocks
# ---------------------------------------------------------------------------
def _border_masks(lane, H, W):
    """(1, L) boolean validity masks for the 9 'same'-padding taps, ordered
    (kh, kw).  The all-valid center tap is returned as None (skip select)."""
    wi = lane % W
    hi = (lane // W) % H
    row = {-1: hi >= 1, 0: None, 1: hi <= H - 2}
    col = {-1: wi >= 1, 0: None, 1: wi <= W - 2}
    masks = []
    for kh in range(3):
        for kw in range(3):
            r, c = row[kh - 1], col[kw - 1]
            if r is None:
                masks.append(c)
            elif c is None:
                masks.append(r)
            else:
                masks.append(jnp.logical_and(r, c))
    return masks


def _conv3x3_same(v, w_mat, bias, masks, *, W, L, roll_np, mxu_dtype):
    """Fused-im2col 3x3 'same' conv + bias + ReLU.

    v:     (Cin, L)       f32 activations, L = NB*H*W flat spatial on lanes
    w_mat: (Cout, 9*Cin)  MXU-dtype weights, contraction ordered (kh, kw, cin)
    bias:  (Cout, 1)      f32
    masks: 9 x (1, L) bool tap-validity masks (None == all valid)
    """
    taps = []
    t = 0
    for kh in range(3):
        for kw in range(3):
            d = (kh - 1) * W + (kw - 1)
            r = _shift_left(v, d, L, roll_np)        # XLU rotate, ~free
            m = masks[t]
            taps.append(r if m is None else jnp.where(m, r, 0.0))
            t += 1
    # Single fused K=9*Cin MXU dot; bf16 operands, f32 accumulation.
    # (If a bundle dump ever shows spills here, split into 3 dots grouped by
    #  kh accumulating into one f32 acc.)
    patches = jnp.concatenate(taps, axis=0).astype(mxu_dtype)
    y = jnp.dot(w_mat, patches, preferred_element_type=jnp.float32)
    return jnp.maximum(y + bias, 0.0)


def _compact_even_blocks(v, lane, block_lanes, n_valid, L, roll_np):
    """Order-preserving compaction of the blocks (groups of `block_lanes`
    lanes) sitting at EVEN block indices into block indices 0..n_valid-1.

    Log-step positional algorithm: at step s, blocks whose destination index
    has bit s set move left by 2^s blocks; the select mask depends only on
    lane position, so kept blocks are never clobbered.  Lanes past the
    compacted region end up holding garbage (they are never stored)."""
    if n_valid <= 1:
        return v
    blk = lane if block_lanes == 1 else lane // block_lanes
    for s in range(int(n_valid - 1).bit_length()):
        stride = 1 << s
        cond = (((blk + stride) // (2 * stride)) % 2) == 1
        v = jnp.where(cond, _shift_left(v, stride * block_lanes, L, roll_np), v)
    return v


def _down_block_kernel(x_ref, w1_ref, b1_ref, w2_ref, b2_ref, out_ref, *,
                       H, W, roll_np, mxu_dtype):
    L = x_ref.shape[-1]
    Lp = out_ref.shape[-1]

    lane = lax.broadcasted_iota(jnp.int32, (1, L), 1)
    masks = _border_masks(lane, H, W)                       # shared by both convs

    x = x_ref[...]                                          # (Cin, L) f32
    y1 = _conv3x3_same(x, w1_ref[...], b1_ref[...], masks,
                       W=W, L=L, roll_np=roll_np, mxu_dtype=mxu_dtype)
    y2 = _conv3x3_same(y1, w2_ref[...], b2_ref[...], masks,
                       W=W, L=L, roll_np=roll_np, mxu_dtype=mxu_dtype)

    # MaxPool2d(2, 2): window max lands on the (even h, even w) lanes ...
    m = jnp.maximum(y2, _shift_left(y2, 1, L, roll_np))     # pair along w
    m = jnp.maximum(m, _shift_left(m, W, L, roll_np))       # pair along h
    # ... then compact those lanes to the front with log-step roll+selects
    # (replaces the old O(L x L/4) one-hot selection matmul).
    m = _compact_even_blocks(m, lane, 1, L // 2, L, roll_np)             # even w
    m = _compact_even_blocks(m, lane, W // 2, L // (2 * W), L, roll_np)  # even h
    out_ref[...] = m[:, :Lp].astype(out_ref.dtype)


# ---------------------------------------------------------------------------
# wrapper
# ---------------------------------------------------------------------------
def _pick_images_per_step(n, hw, hw4):
    """Images per grid step.  Prefer >= 2 grid steps (keeps both TensorCores
    busy on dual-TC chips such as v7x), then lane-dense (multiple-of-128)
    blocks (unmasked vst), then the fewest steps (lowest per-step overhead)."""
    best_key, best = None, n
    for d in range(1, n + 1):
        if n % d:
            continue
        key = ((n // d) >= 2,
               (d * hw4) % 128 == 0 and (d * hw) % 128 == 0,
               d)
        if best_key is None or key > best_key:
            best_key, best = key, d
    return best


def down_block(x_nchw, w1, b1, w2, b2, *, mxu_dtype=jnp.bfloat16):
    """x_nchw: (N, Cin, H, W); w*: torch OIHW (Cout, Cin, 3, 3); b*: (Cout,)."""
    N, Cin, H, W = x_nchw.shape
    Cmid, Cout = w1.shape[0], w2.shape[0]
    assert H % 2 == 0 and W % 2 == 0, "MaxPool2d(2,2) needs even H, W"
    assert w1.shape[1] == Cin and w2.shape[1] == Cmid

    HW = H * W
    hw4 = (H // 2) * (W // 2)
    NB = _pick_images_per_step(N, HW, hw4)      # images per grid step
    L, Lp = NB * HW, NB * hw4
    G = N // NB                                 # grid steps

    roll_np = _roll_is_numpy_convention()
    f32 = jnp.float32

    # ---- layout plumbing (pure transpose/reshape, no compute hoisted) ----
    # For production sizes accept channel-major / pre-blocked I/O instead, so
    # these wrapper-side HBM round-trips disappear (perf-review item 10).
    xt = (x_nchw.astype(f32)
          .reshape(G, NB, Cin, HW)
          .transpose(0, 2, 1, 3)
          .reshape(G, Cin, L))
    # weights: OIHW -> (Cout, 9*Cin) with contraction ordered (kh, kw, cin);
    # cast to the MXU dtype here (accumulation stays f32 in-kernel).
    w1m = jnp.transpose(w1, (0, 2, 3, 1)).reshape(Cmid, 9 * Cin).astype(mxu_dtype)
    w2m = jnp.transpose(w2, (0, 2, 3, 1)).reshape(Cout, 9 * Cmid).astype(mxu_dtype)
    b1m = b1.astype(f32).reshape(Cmid, 1)
    b2m = b2.astype(f32).reshape(Cout, 1)

    kernel = functools.partial(_down_block_kernel, H=H, W=W,
                               roll_np=roll_np, mxu_dtype=mxu_dtype)

    out = pl.pallas_call(
        kernel,
        out_shape=jax.ShapeDtypeStruct((G, Cout, Lp), f32),
        grid_spec=pltpu.PrefetchScalarGridSpec(
            num_scalar_prefetch=0,
            grid=(G,),
            in_specs=[
                pl.BlockSpec((None, Cin, L), lambda b: (b, 0, 0)),
                pl.BlockSpec((Cmid, 9 * Cin), lambda b: (0, 0)),
                pl.BlockSpec((Cmid, 1), lambda b: (0, 0)),
                pl.BlockSpec((Cout, 9 * Cmid), lambda b: (0, 0)),
                pl.BlockSpec((Cout, 1), lambda b: (0, 0)),
            ],
            out_specs=pl.BlockSpec((None, Cout, Lp), lambda b: (b, 0, 0)),
        ),
        # Per-step VMEM is a few KiB now (selector removed); set
        # vmem_limit_bytes here when scaling spatial size (v7x: 64 MiB phys).
        compiler_params=pltpu.CompilerParams(
            dimension_semantics=("parallel",)),
    )(xt, w1m, b1m, w2m, b2m)

    # (G, Cout, NB*(H/2)*(W/2)) -> NCHW
    out = out.reshape(G, Cout, NB, H // 2, W // 2)
    return jnp.transpose(out, (0, 2, 1, 3, 4)).reshape(N, Cout, H // 2, W // 2)


# ---------------------------------------------------------------------------
# plain-JAX reference of the assumed PyTorch forward (NCHW)
# ---------------------------------------------------------------------------
def _reference(x, w1, b1, w2, b2):
    dn = ("NCHW", "OIHW", "NCHW")
    hp = lax.Precision.HIGHEST
    y = lax.conv_general_dilated(x, w1, (1, 1), "SAME",
                                 dimension_numbers=dn, precision=hp)
    y = jnp.maximum(y + b1[None, :, None, None], 0.0)
    y = lax.conv_general_dilated(y, w2, (1, 1), "SAME",
                                 dimension_numbers=dn, precision=hp)
    y = jnp.maximum(y + b2[None, :, None, None], 0.0)
    y = lax.reduce_window(y, -jnp.inf, lax.max,
                          (1, 1, 2, 2), (1, 1, 2, 2), "VALID")
    return y


if __name__ == "__main__":
    N, Cin, Cout, H, W = 2, 4, 8, 16, 16

    key = jax.random.PRNGKey(0)
    kx, k1, kb1, k2, kb2 = jax.random.split(key, 5)

    x = jax.random.normal(kx, (N, Cin, H, W), jnp.float32)
    # deterministic synthetic parameters (torch Conv2d weight layout OIHW)
    w1 = jax.random.normal(k1, (Cout, Cin, 3, 3), jnp.float32) * (1.0 / (Cin * 9)) ** 0.5
    b1 = jax.random.normal(kb1, (Cout,), jnp.float32) * 0.01
    w2 = jax.random.normal(k2, (Cout, Cout, 3, 3), jnp.float32) * (1.0 / (Cout * 9)) ** 0.5
    b2 = jax.random.normal(kb2, (Cout,), jnp.float32) * 0.01

    y_ref = _reference(x, w1, b1, w2, b2)

    # Exact-path check (f32 MXU operands): validates rolls/masks/compaction.
    y_f32 = down_block(x, w1, b1, w2, b2, mxu_dtype=jnp.float32)
    jax.block_until_ready(y_f32)
    assert y_f32.shape == (N, Cout, H // 2, W // 2), y_f32.shape
    err = float(jnp.max(jnp.abs(y_f32 - y_ref)))
    assert err < 2e-4, err

    # Recommended fast path (bf16 MXU operands, f32 accumulation / VPU work).
    # Tolerance is loosened per review: bf16 operand rounding dominates.
    y_bf16 = down_block(x, w1, b1, w2, b2, mxu_dtype=jnp.bfloat16)
    jax.block_until_ready(y_bf16)
    assert y_bf16.shape == (N, Cout, H // 2, W // 2), y_bf16.shape
    err_bf16 = float(jnp.max(jnp.abs(y_bf16 - y_ref)))
    assert err_bf16 < 6e-2, err_bf16

    print("KERNEL_OK")
</pallas_src>

<mosaic_0001>
module attributes {stable_mosaic.version = 11 : i64} {
  func.func @_probe(%arg0: memref<8x128xi32, #tpu.memory_space<vmem>>, %arg1: memref<8x128xi32, #tpu.memory_space<vmem>>) attributes {dimension_semantics = [], scalar_prefetch = 0 : i64, scratch_operands = 0 : i64, tpu.core_type = #tpu.core_type<tc>} {
    %c0 = arith.constant 0 : index
    %c0_0 = arith.constant 0 : index
    %0 = vector.load %arg0[%c0, %c0_0] : memref<8x128xi32, #tpu.memory_space<vmem>>, vector<8x128xi32>
    %c1_i32 = arith.constant 1 : i32
    %1 = tpu.dynamic_rotate %0 by %c1_i32 dim 1 : vector<8x128xi32>, i32 -> vector<8x128xi32>
    %c0_1 = arith.constant 0 : index
    %c0_2 = arith.constant 0 : index
    %2 = vector.load %arg1[%c0_1, %c0_2] : memref<8x128xi32, #tpu.memory_space<vmem>>, vector<8x128xi32>
    tpu.vector_store %arg1[%c0_1, %c0_2], %1 {strides = array<i32>} : memref<8x128xi32, #tpu.memory_space<vmem>>, vector<8x128xi32>,
    return
  }
}

</mosaic_0001>

<bundles_post_ra>
// kernel: tpu_custom_call.1
= control target key start
LH: loop header
LB: loop body
LE: loop exit
PB: predicated region body
PF: predicated region fallthrough
CT: control target
= control target key end

     0   :  { %6 = vsyncpa [#allocation3], 0  ;;  %s118_s0 = inlined_call_operand.hbm [shape: s32[8,128], index: 0, kind: input, shape index: {}]   ;;  %s119_s1 = inlined_call_operand.hbm [shape: s32[8,128], index: 1, kind: output, shape index: {}]  }
   0x1   :  { %7 = vsyncpa [#allocation4], 0  ;;  %s13_s8 = sshll.u32 %s118_s0, 4  ;;  %s99_s9 = smov [#allocation2]   ;;  %s14_s8 = int_to_ptr.hbm [resolvable:$true] %s13_s8 }
   0x2   :  { %s15_s10 = sshll.u32 %s99_s9, 4  ;;  %s16_s10 = int_to_ptr.vmem [resolvable:$true] %s15_s10 }
   0x3   :  { %18 = dma.hbm_to_vmem [thread:$0]  %s14_s8, 128, %s16_s10, [#allocation3]  }
   0x4   :  { %95 = dma.done.wait [#allocation3], 128  }
   0x5   :  { %96 = vsyncadd [#allocation3], 4294967168  ;;  %v23_v0 = vld [vmem:[#allocation2] sm:$0xff]  ;;  %s100_s11 = smov 1   ;;  %s101_s12 = smov [#allocation5]  }
   0x6   :  { %24 = vrot.lane.b32.xlu0 %v23_v0, %s100_s11  ;;  %s32_s13 = sshll.u32 %s101_s12, 4  ;;  %s34_s16 = sshll.u32 %s119_s1, 4  ;;  %s33_s13 = int_to_ptr.vmem [resolvable:$true] %s32_s13  ;;  %s35_s16 = int_to_ptr.hbm [resolvable:$true] %s34_s16 }
  0x78   :  { %v25_v1 = vpop.permute.xlu0 %24 }
  0x79   :  { %26 = vst [vmem:[#allocation5] sm:$0xff] %v25_v1 }
  0x7a   :  { %37 = dma.vmem_to_hbm [thread:$0]  %s33_s13, 128, %s35_s16, [#allocation4]  }
  0x7b   :  { %97 = dma.done.wait [#allocation4], 128  }
  0x7c   :  { %98 = vsyncadd [#allocation4], 4294967168 }
  0x7d   :  { %42 = vsyncpa [#allocation3], 1 }
  0x7e   :  { %43 = vsyncpa [#allocation4], 1 }

</bundles_post_ra>
